<compile_context>
chip_gen: v7x
topology: tpu7x:2x2x1
jax: 0.10.0
libtpu: 0.0.40
codegen_flags: <defaults>
</compile_context>

<pallas_src>
import functools

import jax
import jax.numpy as jnp
from jax import lax
from jax.experimental import pallas as pl
from jax.experimental.pallas import tpu as pltpu

NUM_CLASSES = 3
CLASS_WEIGHTS = (3.8, 3.8, 1.0)   # module "parameters" -> compile-time constants
_LANES = 128
_MAX_ROWS_PER_TILE = 2048          # 2048 rows x 128 lanes = 262,144 samples per grid step


def _wce_partials_kernel(logits_ref, targets_ref, out_ref, *, rows_total, rows_per_tile):
    # logits_ref : (3, R, 128) input dtype (f32 / bf16); class planes on the leading axis
    # targets_ref: (R, 128)    integer class ids
    # out_ref    : (1, 2)      f32 SMEM partial for this tile: [sum w*nll, sum w]
    i = pl.program_id(0)
    n_tiles = pl.num_programs(0)

    x0 = logits_ref[0].astype(jnp.float32)   # (R, 128)
    x1 = logits_ref[1].astype(jnp.float32)
    x2 = logits_ref[2].astype(jnp.float32)
    t = targets_ref[...]                     # (R, 128) int

    # Numerically stable 3-class logsumexp with only 2 transcendental exps:
    # exp(x_max - m) == 1 exactly, so se = 1 + exp(lo - m) + exp(mid - m).
    lo01 = jnp.minimum(x0, x1)
    hi01 = jnp.maximum(x0, x1)
    m = jnp.maximum(hi01, x2)
    mid = jnp.minimum(hi01, x2)
    se = 1.0 + jnp.exp(lo01 - m) + jnp.exp(mid - m)
    lse = m + jnp.log(se)

    # Target logit via two reused compares; weight via a single compare
    # (CLASS_WEIGHTS[0] == CLASS_WEIGHTS[1] == 3.8, CLASS_WEIGHTS[2] == 1.0).
    e0 = t == 0
    e1 = t == 1
    tgt = jnp.where(e0, x0, jnp.where(e1, x1, x2))
    w = jnp.where(t == 2, jnp.float32(CLASS_WEIGHTS[2]), jnp.float32(CLASS_WEIGHTS[0]))
    nll = lse - tgt

    def write(w_, nll_):
        out_ref[0, 0] = jnp.sum(w_ * nll_)
        out_ref[0, 1] = jnp.sum(w_)

    if rows_total % rows_per_tile == 0:
        # No partial tile exists: skip all masking work.
        write(w, nll)
    else:
        # Only the last tile hangs off the end of the array -> mask only there.
        @pl.when(i < n_tiles - 1)
        def _full():
            write(w, nll)

        @pl.when(i == n_tiles - 1)
        def _partial():
            row = i * rows_per_tile + lax.broadcasted_iota(jnp.int32, nll.shape, 0)
            valid = row < rows_total
            # Mask nll too: OOB rows hold garbage logits (possibly inf/NaN); 0*inf = NaN.
            write(jnp.where(valid, w, jnp.float32(0.0)),
                  jnp.where(valid, nll, jnp.float32(0.0)))


def weighted_cross_entropy_loss(outputs, targets):
    """outputs: (N, C) float logits (f32 or bf16); targets: (N,) int class indices.
    Returns scalar f32 loss with PyTorch weighted-mean semantics."""
    n, c = outputs.shape
    assert c == NUM_CLASSES

    t_int = targets if jnp.issubdtype(targets.dtype, jnp.integer) else targets.astype(jnp.int32)

    num = jnp.float32(0.0)
    den = jnp.float32(0.0)

    rows_total = n // _LANES
    n_main = rows_total * _LANES

    if rows_total > 0:
        # TODO(synk): ideally the upstream producer emits logits as (C, N) directly so this
        # transpose copy (one extra HBM pass over the logits) disappears.
        logits_crn = outputs[:n_main].T.reshape(NUM_CLASSES, rows_total, _LANES)
        targets_rn = t_int[:n_main].reshape(rows_total, _LANES)

        rows_per_tile = rows_total if rows_total <= _MAX_ROWS_PER_TILE else _MAX_ROWS_PER_TILE
        n_tiles = pl.cdiv(rows_total, rows_per_tile)

        kernel = functools.partial(_wce_partials_kernel,
                                   rows_total=rows_total, rows_per_tile=rows_per_tile)

        partials = pl.pallas_call(
            kernel,
            out_shape=jax.ShapeDtypeStruct((n_tiles, 2), jnp.float32),
            grid_spec=pltpu.PrefetchScalarGridSpec(
                num_scalar_prefetch=0,
                grid=(n_tiles,),
                in_specs=[
                    pl.BlockSpec((NUM_CLASSES, rows_per_tile, _LANES), lambda i: (0, i, 0)),
                    pl.BlockSpec((rows_per_tile, _LANES), lambda i: (i, 0)),
                ],
                out_specs=pl.BlockSpec((1, 2), lambda i: (i, 0),
                                       memory_space=pltpu.MemorySpace.SMEM),
            ),
            compiler_params=pltpu.CompilerParams(
                # Each grid step writes its own partial -> fully parallel (2 TCs on v7x).
                dimension_semantics=("parallel",),
                # ~8 MiB actually used; set explicitly so v5e's 16 MiB scoped default and
                # v7x's 64 MiB physical VMEM are both comfortably respected.
                vmem_limit_bytes=32 * 1024 * 1024,
            ),
        )(logits_crn, targets_rn)

        num = num + jnp.sum(partials[:, 0])
        den = den + jnp.sum(partials[:, 1])

    if n_main < n:
        # Tail of < 128 samples: tiny pure-JAX epilogue on the same num/den partials.
        x = outputs[n_main:].astype(jnp.float32)
        t = t_int[n_main:].astype(jnp.int32)
        lse = jax.nn.logsumexp(x, axis=-1)
        tgt = jnp.take_along_axis(x, t[:, None], axis=-1)[:, 0]
        w_tab = jnp.asarray(CLASS_WEIGHTS, dtype=jnp.float32)
        w = w_tab[t]
        num = num + jnp.sum(w * (lse - tgt))
        den = den + jnp.sum(w)

    return num / den


def _reference(outputs, targets):
    # Pure-JAX reference mirroring nn.CrossEntropyLoss(weight=w, reduction='mean').
    w = jnp.asarray(CLASS_WEIGHTS, dtype=jnp.float32)
    logp = jax.nn.log_softmax(outputs.astype(jnp.float32), axis=-1)
    nll = -jnp.take_along_axis(logp, targets[:, None].astype(jnp.int32), axis=-1)[:, 0]
    wi = w[targets]
    return jnp.sum(wi * nll) / jnp.sum(wi)


if __name__ == "__main__":
    key = jax.random.PRNGKey(0)
    k1, k2, k3, k4 = jax.random.split(key, 4)

    # Small shape consistent with the module: batch of 512 samples, 3 classes.
    N1 = 512
    outputs1 = jax.random.normal(k1, (N1, NUM_CLASSES), dtype=jnp.float32)
    targets1 = jax.random.randint(k2, (N1,), 0, NUM_CLASSES, dtype=jnp.int32)
    loss1 = jax.block_until_ready(weighted_cross_entropy_loss(outputs1, targets1))
    ref1 = _reference(outputs1, targets1)
    assert jnp.allclose(loss1, ref1, rtol=1e-4, atol=1e-4), (loss1, ref1)

    # Larger bf16 case: 2-tile grid, masked partial second row-tile, and a <128-sample
    # pure-JAX tail (N2 = (2048 + 37) rows * 128 lanes + 96 tail samples).
    N2 = (_MAX_ROWS_PER_TILE + 37) * _LANES + 96
    outputs2 = jax.random.normal(k3, (N2, NUM_CLASSES), dtype=jnp.bfloat16)
    targets2 = jax.random.randint(k4, (N2,), 0, NUM_CLASSES, dtype=jnp.int32)
    loss2 = jax.block_until_ready(weighted_cross_entropy_loss(outputs2, targets2))
    ref2 = _reference(outputs2, targets2)
    assert jnp.allclose(loss2, ref2, rtol=1e-4, atol=1e-4), (loss2, ref2)

    print("KERNEL_OK")
</pallas_src>

<mosaic_0001>
module attributes {stable_mosaic.version = 11 : i64} {
  func.func @_wce_partials_kernel(%arg0: i32, %arg1: memref<3x4x128xf32, #tpu.memory_space<vmem>>, %arg2: memref<4x128xi32, #tpu.memory_space<vmem>>, %arg3: memref<1x2xf32, #tpu.memory_space<smem>>) attributes {dimension_semantics = [#tpu.dimension_semantics<parallel>], iteration_bounds = array<i64: 1>, scalar_prefetch = 0 : i64, scratch_operands = 0 : i64, tpu.core_type = #tpu.core_type<tc>, window_params = [{transform_indices = @transform_0, window_bounds = array<i64: 3, 4, 128>}, {transform_indices = @transform_1, window_bounds = array<i64: 4, 128>}, {transform_indices = @transform_2, window_bounds = array<i64: 1, 2>}]} {
    %c0 = arith.constant 0 : index
    %c0_0 = arith.constant 0 : index
    %c0_1 = arith.constant 0 : index
    %0 = vector.load %arg1[%c0, %c0_0, %c0_1] : memref<3x4x128xf32, #tpu.memory_space<vmem>>, vector<1x4x128xf32>
    %1 = vector.shape_cast %0 : vector<1x4x128xf32> to vector<4x128xf32>
    %c1 = arith.constant 1 : index
    %c0_2 = arith.constant 0 : index
    %c0_3 = arith.constant 0 : index
    %2 = vector.load %arg1[%c1, %c0_2, %c0_3] : memref<3x4x128xf32, #tpu.memory_space<vmem>>, vector<1x4x128xf32>
    %3 = vector.shape_cast %2 : vector<1x4x128xf32> to vector<4x128xf32>
    %c2 = arith.constant 2 : index
    %c0_4 = arith.constant 0 : index
    %c0_5 = arith.constant 0 : index
    %4 = vector.load %arg1[%c2, %c0_4, %c0_5] : memref<3x4x128xf32, #tpu.memory_space<vmem>>, vector<1x4x128xf32>
    %5 = vector.shape_cast %4 : vector<1x4x128xf32> to vector<4x128xf32>
    %c0_6 = arith.constant 0 : index
    %c0_7 = arith.constant 0 : index
    %6 = vector.load %arg2[%c0_6, %c0_7] : memref<4x128xi32, #tpu.memory_space<vmem>>, vector<4x128xi32>
    %7 = arith.minimumf %1, %3 : vector<4x128xf32>
    %8 = arith.maximumf %1, %3 : vector<4x128xf32>
    %9 = arith.maximumf %8, %5 : vector<4x128xf32>
    %10 = arith.minimumf %8, %5 : vector<4x128xf32>
    %11 = arith.subf %7, %9 : vector<4x128xf32>
    %12 = math.exp %11 : vector<4x128xf32>
    %cst = arith.constant 1.000000e+00 : f32
    %13 = vector.broadcast %cst : f32 to vector<4x128xf32>
    %14 = arith.addf %13, %12 : vector<4x128xf32>
    %15 = arith.subf %10, %9 : vector<4x128xf32>
    %16 = math.exp %15 : vector<4x128xf32>
    %17 = arith.addf %14, %16 : vector<4x128xf32>
    %18 = math.log %17 : vector<4x128xf32>
    %19 = arith.addf %9, %18 : vector<4x128xf32>
    %c0_i32 = arith.constant 0 : i32
    %20 = vector.broadcast %c0_i32 : i32 to vector<4x128xi32>
    %21 = arith.cmpi eq, %6, %20 : vector<4x128xi32>
    %c1_i32 = arith.constant 1 : i32
    %22 = vector.broadcast %c1_i32 : i32 to vector<4x128xi32>
    %23 = arith.cmpi eq, %6, %22 : vector<4x128xi32>
    %24 = arith.select %23, %3, %5 : vector<4x128xi1>, vector<4x128xf32>
    %25 = arith.select %21, %1, %24 : vector<4x128xi1>, vector<4x128xf32>
    %c2_i32 = arith.constant 2 : i32
    %26 = vector.broadcast %c2_i32 : i32 to vector<4x128xi32>
    %27 = arith.cmpi eq, %6, %26 : vector<4x128xi32>
    %cst_8 = arith.constant 1.000000e+00 : f32
    %cst_9 = arith.constant 3.800000e+00 : f32
    %28 = vector.broadcast %cst_8 : f32 to vector<4x128xf32>
    %29 = vector.broadcast %cst_9 : f32 to vector<4x128xf32>
    %30 = arith.select %27, %28, %29 : vector<4x128xi1>, vector<4x128xf32>
    %31 = arith.subf %19, %25 : vector<4x128xf32>
    %32 = arith.mulf %30, %31 : vector<4x128xf32>
    %33 = vector.shape_cast %32 : vector<4x128xf32> to vector<1x4x128xf32>
    %cst_10 = arith.constant dense<0.000000e+00> : vector<1xf32>
    %34 = vector.multi_reduction <add>, %33, %cst_10 [1, 2] : vector<1x4x128xf32> to vector<1xf32>
    %35 = vector.shape_cast %34 : vector<1xf32> to vector<1x1x1xf32>
    %36 = vector.extract %35[0, 0, 0] : f32 from vector<1x1x1xf32>
    %c0_11 = arith.constant 0 : index
    %c0_12 = arith.constant 0 : index
    %37 = memref.load %arg3[%c0_11, %c0_12] : memref<1x2xf32, #tpu.memory_space<smem>>
    memref.store %36, %arg3[%c0_11, %c0_12] : memref<1x2xf32, #tpu.memory_space<smem>>
    %38 = vector.shape_cast %30 : vector<4x128xf32> to vector<1x4x128xf32>
    %cst_13 = arith.constant dense<0.000000e+00> : vector<1xf32>
    %39 = vector.multi_reduction <add>, %38, %cst_13 [1, 2] : vector<1x4x128xf32> to vector<1xf32>
    %40 = vector.shape_cast %39 : vector<1xf32> to vector<1x1x1xf32>
    %41 = vector.extract %40[0, 0, 0] : f32 from vector<1x1x1xf32>
    %c0_14 = arith.constant 0 : index
    %c1_15 = arith.constant 1 : index
    %42 = memref.load %arg3[%c0_14, %c1_15] : memref<1x2xf32, #tpu.memory_space<smem>>
    memref.store %41, %arg3[%c0_14, %c1_15] : memref<1x2xf32, #tpu.memory_space<smem>>
    return
  }
  func.func @transform_0(%arg0: i32) -> (i32, i32, i32) {
    %c0_i32 = arith.constant 0 : i32
    %c0_i32_0 = arith.constant 0 : i32
    %c0_i32_1 = arith.constant 0 : i32
    return %c0_i32, %arg0, %c0_i32_0 : i32, i32, i32
  }
  func.func @transform_1(%arg0: i32) -> (i32, i32) {
    %c0_i32 = arith.constant 0 : i32
    %c0_i32_0 = arith.constant 0 : i32
    return %arg0, %c0_i32 : i32, i32
  }
  func.func @transform_2(%arg0: i32) -> (i32, i32) {
    %c0_i32 = arith.constant 0 : i32
    %c0_i32_0 = arith.constant 0 : i32
    return %arg0, %c0_i32 : i32, i32
  }
}

</mosaic_0001>

<bundles_post_ra>
// kernel: tpu_custom_call.1
= control target key start
LH: loop header
LB: loop body
LE: loop exit
PB: predicated region body
PF: predicated region fallthrough
CT: control target
= control target key end

     0   :  { %7 = vsyncpa [#allocation3], 0  ;;  %s240_s0 = inlined_call_operand.hbm [shape: f32[3,4,128], index: 0, kind: input, shape index: {}]   ;;  %s241_s1 = inlined_call_operand.hbm [shape: s32[4,128], index: 1, kind: input, shape index: {}]   ;;  %s242_s2 = inlined_call_operand.hbm [shape: f32[1,2], index: 2, kind: output, shape index: {}]  }
   0x1   :  { %8 = vsyncpa [#allocation6], 0 }
   0x2   :  { %9 = vsyncpa [#allocation4], 0  ;;  %s183_s9 = smov [#allocation2]   ;;  %s123_s13 = scalar_lea.hbm %s240_s0, 192 }
   0x3   :  { %s15_s10 = sshll.u32 %s183_s9, 4  ;;  %p124_p0 = scmp.ne.s32.totalorder %s240_s0, %s123_s13  ;;  %s16_s10 = int_to_ptr.vmem [resolvable:$true] %s15_s10 }
   0x4   :  { %p127_p1 = scmp.lt.u32.totalorder %s123_s13, %s240_s0 }
   0x6   :  { %p129_p2 = pnand %p127_p1, %p124_p0 }
   0x8   :  { %132 = shalt.err (!%p129_p2)
}
   0x9   :  { %s133_s18 = scalar_lea.vmem %s16_s10, 192  ;;  %p138_p4 = scmp.lt.s32.totalorder %s16_s10, %s16_s10 }
   0xa   :  { %p134_p3 = scmp.ne.s32.totalorder %s16_s10, %s133_s18  ;;  %p139_p5 = scmp.lt.s32.totalorder %s133_s18, %s133_s18 }
   0xc   :  { %p140_p6 = por %p139_p5, %p138_p4 }
   0xe   :  { %p141_p7 = pnand %p140_p6, %p134_p3 }
  0x10   :  { %144 = shalt.err (!%p141_p7)
}
  0x11   :  { %s184_s19 = smov 64   ;;  %s185_s20 = smov 4  }
  0x12   :  { %21 = dma.hbm_to_vmem [thread:$0]  %s240_s0, 192, %s16_s10, [#allocation3], %s184_s19, %s184_s19, %s185_s20  }
  0x13   :  { %s186_s23 = smov [#allocation5]   ;;  %s145_s27 = scalar_lea.hbm %s241_s1, 64 }
  0x14   :  { %s28_s24 = sshll.u32 %s186_s23, 4  ;;  %p146_p8 = scmp.ne.s32.totalorder %s241_s1, %s145_s27  ;;  %s29_s24 = int_to_ptr.vmem [resolvable:$true] %s28_s24 }
  0x15   :  { %p149_p9 = scmp.lt.u32.totalorder %s145_s27, %s241_s1 }
  0x17   :  { %p151_p10 = pnand %p149_p9, %p146_p8 }
  0x19   :  { %154 = shalt.err (!%p151_p10)
}
  0x1a   :  { %s155_s4 = scalar_lea.vmem %s29_s24, 64  ;;  %p160_p12 = scmp.lt.s32.totalorder %s29_s24, %s29_s24 }
  0x1b   :  { %p156_p11 = scmp.ne.s32.totalorder %s29_s24, %s155_s4  ;;  %p161_p13 = scmp.lt.s32.totalorder %s155_s4, %s155_s4 }
  0x1d   :  { %p162_p0 = por %p161_p13, %p160_p12 }
  0x1f   :  { %p163_p1 = pnand %p162_p0, %p156_p11 }
  0x21   :  { %166 = shalt.err (!%p163_p1)
}
  0x22   :  { %31 = dma.hbm_to_vmem [thread:$0]  %s241_s1, 64, %s29_s24, [#allocation6]  }
  0x23   :  { %177 = dma.done.wait [#allocation3], 192  }
  0x24   :  { %178 = vsyncadd [#allocation3], 4294967104 }
  0x25   :  { %179 = dma.done.wait [#allocation6], 64  }
  0x26   :  { %180 = vsyncadd [#allocation6], 4294967232  ;;  %v38_v0 = vld [vmem:[#allocation2] sm:$0xf]  ;;  %v40_v1 = vld [vmem:[#allocation2 + $0x4] sm:$0xf] }
  0x27   :  { %v42_v2 = vld [vmem:[#allocation2 + $0x8] sm:$0xf]  ;;  %v44_v3 = vmin.f32 %v38_v0, %v40_v1  ;;  %v45_v4 = vmax.f32 %v38_v0, %v40_v1  ;;  %v43_v15 = vld [vmem:[#allocation5] sm:$0xf]  ;;  %v187_v21 = vmov 3.8  }
  0x28   :  { %vm60_vm0 = vcmp.eq.s32.totalorder %v43_v15, 1  ;;  %vm59_vm1 = vcmp.eq.s32.totalorder %v43_v15, 0  ;;  %vm63_vm2 = vcmp.eq.s32.totalorder %v43_v15, 2  ;;  %vm67_vm3 = vcmask 1043456   ;;  %s167_s9 = scalar_lea.hbm %s242_s2, 16 }
  0x29   :  { %v46_v5 = vmax.f32 %v45_v4, %v42_v2  ;;  %v47_v6 = vmin.f32 %v45_v4, %v42_v2  ;;  %v61_v16 = vsel %vm60_vm0, %v40_v1, %v42_v2  ;;  %v64_v22 = vsel %vm63_vm2, 1.0, %v187_v21  ;;  %p168_p2 = scmp.ne.s32.totalorder %s242_s2, %s167_s9  ;;  %p171_p3 = scmp.lt.u32.totalorder %s167_s9, %s242_s2 }
  0x2a   :  { %v62_v19 = vsel %vm59_vm1, %v38_v0, %v61_v16  ;;  %v80_v26 = vsel %vm67_vm3, %v64_v22, 0.0 }
  0x2b   :  { %v48_v7 = vsub.f32 %v44_v3, %v46_v5  ;;  %v52_v8 = vsub.f32 %v47_v6, %v46_v5  ;;  %p173_p4 = pnand %p171_p3, %p168_p2 }
  0x2d   :  { %v49_v9 = vmul.f32 1.442695, %v48_v7  ;;  %v53_v10 = vmul.f32 1.442695, %v52_v8 }
  0x2f   :  { %117 = vpow2.f32 %v49_v9 }
  0x30   :  { %119 = vpow2.f32 %v53_v10 }
  0x39   :  { %v118_v11 = vpop.eup %117 }
  0x3a   :  { %v120_v12 = vpop.eup %119  ;;  %v51_v13 = vadd.f32 1.0, %v118_v11 }
  0x3c   :  { %v55_v14 = vadd.f32 %v120_v12, %v51_v13 }
  0x3e   :  { %121 = vlog2.f32 %v55_v14 }
  0x48   :  { %v122_v17 = vpop.eup %121 }
  0x49   :  { %v57_v18 = vmul.f32 0.6931472, %v122_v17 }
  0x4b   :  { %v58_v20 = vadd.f32 %v57_v18, %v46_v5 }
  0x4d   :  { %v65_v23 = vsub.f32 %v58_v20, %v62_v19 }
  0x4f   :  { %v66_v24 = vmul.f32 %v65_v23, %v64_v22 }
  0x51   :  { %v68_v25 = vsel %vm67_vm3, %v66_v24, 0.0 }
  0x52   :  { %69 = vadd.xlane.f32.xlu0 %v68_v25 }
  0x56   :  { %81 = vadd.xlane.f32.xlu0 %v80_v26 }
  0xdf   :  { %v70_v27 = vpop.xlane.xlu0 %69 }
  0xe0   :  { %v71_v28 = vrot.slane %v70_v27, 4 }
  0xe2   :  { %v72_v29 = vadd.f32 %v71_v28, %v70_v27 }
  0xe3   :  { %v82_v30 = vpop.xlane.xlu0 %81 }
  0xe4   :  { %v73_v31 = vrot.slane %v72_v29, 2  ;;  %v83_v32 = vrot.slane %v82_v30, 4 }
  0xe6   :  { %v84_v33 = vadd.f32 %v83_v32, %v82_v30  ;;  %v74_v34 = vadd.f32 %v73_v31, %v72_v29 }
  0xe8   :  { %v85_v35 = vrot.slane %v84_v33, 2  ;;  %v75_v36 = vrot.slane %v74_v34, 1 }
  0xea   :  { %v86_v37 = vadd.f32 %v85_v35, %v84_v33  ;;  %v76_v38 = vadd.f32 %v75_v36, %v74_v34 }
  0xec   :  { %107 = vpush %v76_v38  ;;  %v87_v39 = vrot.slane %v86_v37, 1 }
  0xee   :  { %v88_v40 = vadd.f32 %v87_v39, %v86_v37 }
  0xf0   :  { %109 = vpush %v88_v40 }
 0x11d   :  { %s108_s1 = spop %107 }
 0x11e   :  { %79 = sst [smem:[#allocation7]] %s108_s1 }
 0x121   :  { %s110_s6 = spop %109 }
 0x122   :  { %91 = sst [smem:[#allocation7 + $0x1]] %s110_s6 }
 0x123   :  { %176 = shalt.err (!%p173_p4)
}
 0x124   :  { %s188_s14 = smov [#allocation7]  }
 0x125   :  { %99 = dma.smem_to_hbm %s188_s14, 16, %s242_s2, [#allocation4]  }
 0x126   :  { %181 = dma.done.wait [#allocation4], 16  }
 0x127   :  { %182 = vsyncadd [#allocation4], 4294967280 }
 0x128   :  { %103 = sfence }
 0x129   :  { %104 = vsyncpa [#allocation3], 1 }
 0x12a   :  { %105 = vsyncpa [#allocation6], 1 }
 0x12b   :  { %106 = vsyncpa [#allocation4], 1 }

</bundles_post_ra>
